<compile_context>
chip_gen: v6e
topology: v6e:2x2x1
jax: 0.10.0
libtpu: 0.0.40
codegen_flags: <defaults>
</compile_context>

<pallas_src>
import functools

import jax
import jax.numpy as jnp
from jax.experimental import pallas as pl
from jax.experimental.pallas import tpu as pltpu

SCALE = 0.5 ** 0.5  # torch.sqrt(torch.FloatTensor([0.5]))


def _round_up(x, m):
    return ((x + m - 1) // m) * m


def feature_transformer_kernel(o_pad, x_ref, wfc_ref, bfc_ref, w12_ref, b12_ref, o_ref):
    # x_ref:  (TM, I)        bf16   (streamed per batch tile)
    # wfc_ref:(I, O_pad)     bf16   (VMEM-resident)
    # bfc_ref:(1, O_pad)     f32    (VMEM-resident)
    # w12_ref:(O_pad, 2*O_pad) bf16 (VMEM-resident, fused GLU fc1|fc2)
    # b12_ref:(1, 2*O_pad)   f32    (VMEM-resident)
    # o_ref:  (TM, O_pad)    f32
    x = x_ref[...]
    # fc_layer: bf16 x bf16 -> f32 accumulation on the MXU.
    y = jnp.dot(x, wfc_ref[...], preferred_element_type=jnp.float32) + bfc_ref[...]
    # GLU: one fused MXU pass for fc1|fc2, split at the lane-aligned O_pad boundary.
    z = jnp.dot(y.astype(jnp.bfloat16), w12_ref[...],
                preferred_element_type=jnp.float32) + b12_ref[...]
    sig = jax.nn.sigmoid(z[:, :o_pad])      # EUP
    lin = z[:, o_pad:]
    # residual add + scale (dropout = identity at eval)
    o_ref[...] = (y + sig * lin) * SCALE


def pack_params(p, input_size, output_size):
    """Lane-pad output_size up to a multiple of 128, fuse GLU weights, cast weights to bf16."""
    o_pad = _round_up(output_size, 128)
    do = o_pad - output_size
    w_fc = jnp.pad(p["w_fc"], ((0, 0), (0, do))).astype(jnp.bfloat16)   # (I, O_pad)
    b_fc = jnp.pad(p["b_fc"], ((0, 0), (0, do)))                        # (1, O_pad) f32
    w1 = jnp.pad(p["w1"], ((0, do), (0, do)))
    w2 = jnp.pad(p["w2"], ((0, do), (0, do)))
    b1 = jnp.pad(p["b1"], ((0, 0), (0, do)))
    b2 = jnp.pad(p["b2"], ((0, 0), (0, do)))
    return {
        "w_fc": w_fc,                                                    # (I, O_pad) bf16
        "b_fc": b_fc,                                                    # (1, O_pad) f32
        "w12": jnp.concatenate([w1, w2], axis=1).astype(jnp.bfloat16),   # (O_pad, 2*O_pad) bf16
        "b12": jnp.concatenate([b1, b2], axis=1),                        # (1, 2*O_pad) f32
        "in_dim": input_size,
        "out_dim": output_size,
    }


def feature_transformer(x, packed, *, block_m=512):
    """x: (B, input_size) f32. packed: output of pack_params(). Returns (B, output_size) f32."""
    B, I = x.shape
    o_pad = packed["b_fc"].shape[1]
    out_dim = packed["out_dim"]

    # Balanced batch tile (multiple of 8): bounds pad waste to <8 rows and guarantees >=2 grid
    # steps when the batch is big enough, so v7x's two TensorCores both get work.
    n_blocks = max(1, pl.cdiv(B, block_m))
    if n_blocks < 2 and B >= 128:
        n_blocks = 2
    tm = _round_up(pl.cdiv(B, n_blocks), 8)
    grid = (pl.cdiv(B, tm),)

    # Stream x as bf16 (halves x DMA bytes; matmul accumulates in f32 anyway).
    x_b = x.astype(jnp.bfloat16)

    wfc_bytes = packed["w_fc"].size * 2
    w12_bytes = packed["w12"].size * 2
    bias_bytes = (packed["b_fc"].size + packed["b12"].size) * 4

    # Advisory cost estimate for XLA's scheduler.
    cost = pl.CostEstimate(
        flops=2 * B * (I * o_pad + o_pad * 2 * o_pad),
        transcendentals=B * o_pad,
        bytes_accessed=2 * B * I + wfc_bytes + w12_bytes + bias_bytes + 4 * B * o_pad,
    )

    # Exact VMEM accounting: double-buffered x/out tiles + resident weights + y/z intermediates.
    block_bytes = (
        2 * tm * I * 2            # x tiles (bf16, double-buffered)
        + 2 * tm * o_pad * 4      # out tiles (f32, double-buffered)
        + wfc_bytes + w12_bytes + bias_bytes
        + tm * o_pad * (4 + 2)    # y (f32) + y cast to bf16
        + tm * 2 * o_pad * 4      # z (f32)
    )
    try:
        vmem_cap = pltpu.get_tpu_info().vmem_capacity_bytes
    except Exception:
        vmem_cap = 128 * 2 ** 20
    vmem_limit = int(min(int(0.75 * vmem_cap), max(32 * 2 ** 20, int(1.25 * block_bytes))))

    out = pl.pallas_call(
        functools.partial(feature_transformer_kernel, o_pad),
        out_shape=jax.ShapeDtypeStruct((B, o_pad), jnp.float32),
        grid_spec=pltpu.PrefetchScalarGridSpec(
            num_scalar_prefetch=0,
            grid=grid,
            in_specs=[
                pl.BlockSpec((tm, I), lambda i: (i, 0)),               # x: pipelined per tile
                pl.BlockSpec((I, o_pad), lambda i: (0, 0)),            # w_fc: resident
                pl.BlockSpec((1, o_pad), lambda i: (0, 0)),            # b_fc: resident
                pl.BlockSpec((o_pad, 2 * o_pad), lambda i: (0, 0)),    # w12: resident
                pl.BlockSpec((1, 2 * o_pad), lambda i: (0, 0)),        # b12: resident
            ],
            out_specs=pl.BlockSpec((tm, o_pad), lambda i: (i, 0)),
        ),
        compiler_params=pltpu.CompilerParams(
            dimension_semantics=("parallel",),
            vmem_limit_bytes=vmem_limit,
        ),
        cost_estimate=cost,
    )(x_b, packed["w_fc"], packed["b_fc"], packed["w12"], packed["b12"])

    # Lane slice back to the logical output width (padded lanes are exactly zero).
    return out[:, :out_dim]


def init_params(key, input_size, output_size):
    """Deterministic synthetic parameter init (shapes match nn.Linear layers)."""
    ks = jax.random.split(key, 6)

    def lin(kw, kb, fan_in, fan_out):
        bound = 1.0 / (fan_in ** 0.5)
        # PyTorch nn.Linear stores weight as (out, in); we pre-transpose to (in, out).
        w = jax.random.uniform(kw, (fan_in, fan_out), jnp.float32, -bound, bound)
        b = jax.random.uniform(kb, (1, fan_out), jnp.float32, -bound, bound)
        return w, b

    w_fc, b_fc = lin(ks[0], ks[1], input_size, output_size)   # fc_layer
    w1, b1 = lin(ks[2], ks[3], output_size, output_size)      # glu.fc1
    w2, b2 = lin(ks[4], ks[5], output_size, output_size)      # glu.fc2
    return {"w_fc": w_fc, "b_fc": b_fc, "w1": w1, "b1": b1, "w2": w2, "b2": b2}


def feature_transformer_ref(x, p):
    """Pure-JAX f32 reference of the PyTorch forward (eval mode)."""
    y = x @ p["w_fc"] + p["b_fc"]
    glu = jax.nn.sigmoid(y @ p["w1"] + p["b1"]) * (y @ p["w2"] + p["b2"])
    return (y + glu) * SCALE


def _check_case(key, batch, input_size, output_size, block_m):
    k_x, k_p = jax.random.split(key)
    x = jax.random.normal(k_x, (batch, input_size), jnp.float32)
    params = init_params(k_p, input_size, output_size)
    packed = pack_params(params, input_size, output_size)

    out = jax.block_until_ready(feature_transformer(x, packed, block_m=block_m))
    ref = feature_transformer_ref(x, params)

    assert out.shape == (batch, output_size)
    # bf16 matmuls with f32 accumulation vs the f32 reference -> loose tolerance.
    assert jnp.allclose(out, ref, atol=5e-2, rtol=5e-2), (
        f"mismatch vs reference (B={batch}, I={input_size}, O={output_size})")


if __name__ == "__main__":
    key = jax.random.PRNGKey(0)
    k_small, k_big = jax.random.split(key)

    # Small case (single tile).
    _check_case(k_small, batch=8, input_size=16, output_size=32, block_m=512)
    # Larger case: multi-tile grid, ragged last block, dims > 128, megacore-shardable batch.
    _check_case(k_big, batch=521, input_size=192, output_size=160, block_m=256)

    print("KERNEL_OK")
</pallas_src>

<mosaic_0001>
module attributes {stable_mosaic.version = 11 : i64} {
  func.func @feature_transformer_kernel(%arg0: i32, %arg1: memref<8x16xbf16, #tpu.memory_space<vmem>>, %arg2: memref<16x128xbf16, #tpu.memory_space<vmem>>, %arg3: memref<1x128xf32, #tpu.memory_space<vmem>>, %arg4: memref<128x256xbf16, #tpu.memory_space<vmem>>, %arg5: memref<1x256xf32, #tpu.memory_space<vmem>>, %arg6: memref<8x128xf32, #tpu.memory_space<vmem>>) attributes {dimension_semantics = [#tpu.dimension_semantics<parallel>], iteration_bounds = array<i64: 1>, scalar_prefetch = 0 : i64, scratch_operands = 0 : i64, tpu.core_type = #tpu.core_type<tc>, window_params = [{transform_indices = @transform_0, window_bounds = array<i64: 8, 16>}, {pipeline_mode = #tpu.pipeline_mode<synchronous>, transform_indices = @transform_1, window_bounds = array<i64: 16, 128>}, {pipeline_mode = #tpu.pipeline_mode<synchronous>, transform_indices = @transform_2, window_bounds = array<i64: 1, 128>}, {pipeline_mode = #tpu.pipeline_mode<synchronous>, transform_indices = @transform_3, window_bounds = array<i64: 128, 256>}, {pipeline_mode = #tpu.pipeline_mode<synchronous>, transform_indices = @transform_4, window_bounds = array<i64: 1, 256>}, {transform_indices = @transform_5, window_bounds = array<i64: 8, 128>}]} {
    %c0 = arith.constant 0 : index
    %c0_0 = arith.constant 0 : index
    %0 = vector.load %arg1[%c0, %c0_0] : memref<8x16xbf16, #tpu.memory_space<vmem>>, vector<8x16xbf16>
    %c0_1 = arith.constant 0 : index
    %c0_2 = arith.constant 0 : index
    %1 = vector.load %arg2[%c0_1, %c0_2] : memref<16x128xbf16, #tpu.memory_space<vmem>>, vector<16x128xbf16>
    %cst = arith.constant dense<0.000000e+00> : vector<8x128xf32>
    %2 = tpu.matmul %0, %1, %cst {dimension_numbers = #tpu.dot_dimension_numbers<[1], [0], [0], [1], [0, 0, 1, 1], [], []>} : vector<8x16xbf16>, vector<16x128xbf16>, vector<8x128xf32> -> vector<8x128xf32>
    %c0_3 = arith.constant 0 : index
    %c0_4 = arith.constant 0 : index
    %3 = vector.load %arg3[%c0_3, %c0_4] : memref<1x128xf32, #tpu.memory_space<vmem>>, vector<1x128xf32>
    %4 = vector.broadcast %3 : vector<1x128xf32> to vector<8x128xf32>
    %5 = arith.addf %2, %4 : vector<8x128xf32>
    %6 = arith.truncf %5 : vector<8x128xf32> to vector<8x128xbf16>
    %c0_5 = arith.constant 0 : index
    %c0_6 = arith.constant 0 : index
    %7 = vector.load %arg4[%c0_5, %c0_6] : memref<128x256xbf16, #tpu.memory_space<vmem>>, vector<128x256xbf16>
    %cst_7 = arith.constant dense<0.000000e+00> : vector<8x256xf32>
    %8 = tpu.matmul %6, %7, %cst_7 {dimension_numbers = #tpu.dot_dimension_numbers<[1], [0], [0], [1], [0, 0, 1, 1], [], []>} : vector<8x128xbf16>, vector<128x256xbf16>, vector<8x256xf32> -> vector<8x256xf32>
    %c0_8 = arith.constant 0 : index
    %c0_9 = arith.constant 0 : index
    %9 = vector.load %arg5[%c0_8, %c0_9] : memref<1x256xf32, #tpu.memory_space<vmem>>, vector<1x256xf32>
    %10 = vector.broadcast %9 : vector<1x256xf32> to vector<8x256xf32>
    %11 = arith.addf %8, %10 : vector<8x256xf32>
    %12 = vector.extract_strided_slice %11 {offsets = [0, 0], sizes = [8, 128], strides = [1, 1]} : vector<8x256xf32> to vector<8x128xf32>
    %13 = arith.negf %12 : vector<8x128xf32>
    %14 = math.exp %13 : vector<8x128xf32>
    %cst_10 = arith.constant 1.000000e+00 : f32
    %15 = vector.broadcast %cst_10 : f32 to vector<8x128xf32>
    %16 = arith.addf %15, %14 : vector<8x128xf32>
    %17 = arith.divf %15, %16 : vector<8x128xf32>
    %18 = vector.extract_strided_slice %11 {offsets = [0, 128], sizes = [8, 128], strides = [1, 1]} : vector<8x256xf32> to vector<8x128xf32>
    %19 = arith.mulf %17, %18 : vector<8x128xf32>
    %20 = arith.addf %5, %19 : vector<8x128xf32>
    %cst_11 = arith.constant 0.707106769 : f32
    %21 = vector.broadcast %cst_11 : f32 to vector<8x128xf32>
    %22 = arith.mulf %20, %21 : vector<8x128xf32>
    %c0_12 = arith.constant 0 : index
    %c0_13 = arith.constant 0 : index
    %23 = vector.load %arg6[%c0_12, %c0_13] : memref<8x128xf32, #tpu.memory_space<vmem>>, vector<8x128xf32>
    tpu.vector_store %arg6[%c0_12, %c0_13], %22 {strides = array<i32>} : memref<8x128xf32, #tpu.memory_space<vmem>>, vector<8x128xf32>,
    return
  }
  func.func @transform_0(%arg0: i32) -> (i32, i32) {
    %c0_i32 = arith.constant 0 : i32
    %c0_i32_0 = arith.constant 0 : i32
    return %arg0, %c0_i32 : i32, i32
  }
  func.func @transform_1(%arg0: i32) -> (i32, i32) {
    %c0_i32 = arith.constant 0 : i32
    %c0_i32_0 = arith.constant 0 : i32
    %c0_i32_1 = arith.constant 0 : i32
    return %c0_i32, %c0_i32_0 : i32, i32
  }
  func.func @transform_2(%arg0: i32) -> (i32, i32) {
    %c0_i32 = arith.constant 0 : i32
    %c0_i32_0 = arith.constant 0 : i32
    %c0_i32_1 = arith.constant 0 : i32
    return %c0_i32, %c0_i32_0 : i32, i32
  }
  func.func @transform_3(%arg0: i32) -> (i32, i32) {
    %c0_i32 = arith.constant 0 : i32
    %c0_i32_0 = arith.constant 0 : i32
    %c0_i32_1 = arith.constant 0 : i32
    return %c0_i32, %c0_i32_0 : i32, i32
  }
  func.func @transform_4(%arg0: i32) -> (i32, i32) {
    %c0_i32 = arith.constant 0 : i32
    %c0_i32_0 = arith.constant 0 : i32
    %c0_i32_1 = arith.constant 0 : i32
    return %c0_i32, %c0_i32_0 : i32, i32
  }
  func.func @transform_5(%arg0: i32) -> (i32, i32) {
    %c0_i32 = arith.constant 0 : i32
    %c0_i32_0 = arith.constant 0 : i32
    return %arg0, %c0_i32 : i32, i32
  }
}

</mosaic_0001>

<bundles_post_ra>
// kernel: tpu_custom_call.1
= control target key start
LH: loop header
LB: loop body
LE: loop exit
PB: predicated region body
PF: predicated region fallthrough
CT: control target
= control target key end

     0   :  { %10 = vsyncpa [#allocation3], 0  ;;  %s510_s0 = inlined_call_operand.hbm [shape: bf16[8,16], index: 0, kind: input, shape index: {}]   ;;  %s511_s1 = inlined_call_operand.hbm [shape: bf16[16,128], index: 1, kind: input, shape index: {}]   ;;  %s512_s2 = inlined_call_operand.vmem [shape: f32[1,128], index: 2, kind: input, shape index: {}]   ;;  %s513_s3 = inlined_call_operand.hbm [shape: bf16[128,256], index: 3, kind: input, shape index: {}]   ;;  %s514_s4 = inlined_call_operand.vmem [shape: f32[1,256], index: 4, kind: input, shape index: {}]   ;;  %s515_s5 = inlined_call_operand.hbm [shape: f32[8,128], index: 5, kind: output, shape index: {}]  }
   0x1   :  { %11 = vsyncpa [#allocation6], 0 }
   0x2   :  { %12 = vsyncpa [#allocation4], 0  ;;  %s451_s18 = smov [#allocation5]  }
   0x3   :  { %s28_s19 = sshll.u32 %s451_s18, 4  ;;  %s29_s19 = int_to_ptr.vmem [resolvable:$true] %s28_s19 }
   0x4   :  { %s373_s20 = scalar_lea.vmem %s29_s19, 128  ;;  %p378_p1 = scmp.lt.s32.totalorder %s29_s19, %s29_s19 }
   0x5   :  { %p374_p0 = scmp.ne.s32.totalorder %s29_s19, %s373_s20  ;;  %p379_p2 = scmp.lt.s32.totalorder %s373_s20, %s373_s20 }
   0x7   :  { %p380_p3 = por %p379_p2, %p378_p1 }
   0x9   :  { %p381_p4 = pnand %p380_p3, %p374_p0 }
   0xb   :  { %384 = shalt.err (!%p381_p4)
}
   0xc   :  { %s452_s21 = smov 64   ;;  %s453_s22 = smov 4  }
   0xd   :  { %34 = dma.hbm_to_vmem [thread:$0]  %s511_s1, 128, %s29_s19, [#allocation6], %s452_s21, %s452_s21, %s453_s22  }
   0xe   :  { %s454_s25 = smov [#allocation2]   ;;  %s455_s27 = smov [#allocation7]  }
   0xf   :  { %s19_s26 = sshll.u32 %s454_s25, 4  ;;  %s42_s28 = sshll.u32 %s455_s27, 4  ;;  %s20_s26 = int_to_ptr.vmem [resolvable:$true] %s19_s26  ;;  %s43_s28 = int_to_ptr.vmem [resolvable:$true] %s42_s28 }
  0x10   :  { %s393_s29 = scalar_lea.vmem %s20_s26, 64  ;;  %p398_p6 = scmp.lt.s32.totalorder %s20_s26, %s20_s26 }
  0x11   :  { %p394_p5 = scmp.ne.s32.totalorder %s20_s26, %s393_s29  ;;  %p399_p7 = scmp.lt.s32.totalorder %s393_s29, %s393_s29 }
  0x13   :  { %p400_p8 = por %p399_p7, %p398_p6 }
  0x15   :  { %p401_p9 = pnand %p400_p8, %p394_p5 }
  0x17   :  { %404 = shalt.err (!%p401_p9)
}
  0x18   :  { %22 = dma.hbm_to_vmem [thread:$0]  %s510_s0, 64, %s20_s26, [#allocation3]  }
  0x19   :  { %s413_s7 = scalar_lea.vmem %s43_s28, 2048  ;;  %p418_p11 = scmp.lt.s32.totalorder %s43_s28, %s43_s28 }
  0x1a   :  { %p414_p10 = scmp.ne.s32.totalorder %s43_s28, %s413_s7  ;;  %p419_p12 = scmp.lt.s32.totalorder %s413_s7, %s413_s7 }
  0x1c   :  { %p420_p13 = por %p419_p12, %p418_p11 }
  0x1e   :  { %p421_p0 = pnand %p420_p13, %p414_p10 }
  0x20   :  { %424 = shalt.err (!%p421_p0)
}
  0x21   :  { %s456_s1 = smov 128   ;;  %s457_s8 = smov 8  }
  0x22   :  { %48 = dma.hbm_to_vmem [thread:$0]  %s513_s3, 2048, %s43_s28, [#allocation6], %s456_s1, %s456_s1, %s457_s8  }
  0x23   :  { %445 = dma.done.wait [#allocation3], 64  }
  0x24   :  { %446 = vsyncadd [#allocation3], 4294967232 }
  0x25   :  { %447 = dma.done.wait [#allocation6], 2176  }
  0x26   :  { %448 = vsyncadd [#allocation6], 4294965120  ;;  %v458_v0 = vmov 0.0   ;;  %vm459_vm0 = vmmov 0   ;;  %v336_v1 = vld [vmem:[#allocation5] sm:$0xff]   ;;  %vm77_vm1 = vcmask 130048   ;;  %v140_v27 = vlaneseq }
  0x27   :  { %319 = vmatprep.subr.bf16.mxu0 %v458_v0  ;;  %321 = vmatprep.mubr.msk.bf16.mxu0 %vm459_vm0, %v458_v0  ;;  %v61_v2 = vld [vmem:[#allocation2] sm:$0xf]  ;;  %v339_v4 = vld [vmem:[#allocation7 + $0x70] ss:$8 sps:$4 sm:$0xff]   ;;  %v340_v5 = vld [vmem:[#allocation7 + $0x64] ss:$8 sps:$4 sm:$0xff]  }
  0x28   :  { %320 = vmatpush3.bf16.msra.mxu0 %v336_v1  ;;  %v337_v3 = vld [vmem:[#allocation7 + $0x74] ss:$8 sps:$4 sm:$0xff]   ;;  %v342_v6 = vld [vmem:[#allocation7 + $0x60] ss:$8 sps:$4 sm:$0xff]   ;;  %v345_v8 = vld [vmem:[#allocation7 + $0x50] ss:$8 sps:$4 sm:$0xff]  }
  0x29   :  { %230 = vmatprep.subr.bf16.mxu1 %v337_v3  ;;  %v343_v7 = vld [vmem:[#allocation7 + $0x54] ss:$8 sps:$4 sm:$0xff]   ;;  %v346_v9 = vld [vmem:[#allocation7 + $0x44] ss:$8 sps:$4 sm:$0xff]   ;;  %v348_v10 = vld [vmem:[#allocation7 + $0x40] ss:$8 sps:$4 sm:$0xff]  }
  0x2a   :  { %231 = vmatpush1.bf16.msra.mxu1 %v339_v4  ;;  %v349_v11 = vld [vmem:[#allocation7 + $0x34] ss:$8 sps:$4 sm:$0xff]   ;;  %v351_v12 = vld [vmem:[#allocation7 + $0x30] ss:$8 sps:$4 sm:$0xff]   ;;  %v352_v13 = vld [vmem:[#allocation7 + $0x24] ss:$8 sps:$4 sm:$0xff]  }
  0x2b   :  { %322 = vmatmul.mubr.msk.bf16.vlgmr.msra.gmra.mxu0 %vm77_vm1, %v61_v2  ;;  %232 = vmatprep.subr.bf16.mxu1 %v340_v5  ;;  %v354_v14 = vld [vmem:[#allocation7 + $0x20] ss:$8 sps:$4 sm:$0xff]   ;;  %v355_v15 = vld [vmem:[#allocation7 + $0x14] ss:$8 sps:$4 sm:$0xff]   ;;  %v357_v16 = vld [vmem:[#allocation7 + $0x10] ss:$8 sps:$4 sm:$0xff]  }
  0x2c   :  { %v358_v17 = vld [vmem:[#allocation7 + $0x4] ss:$8 sps:$4 sm:$0xff]   ;;  %v360_v18 = vld [vmem:[#allocation7] ss:$8 sps:$4 sm:$0xff]   ;;  %v460_v19 = vmov 0   ;;  %v141_v28 = vshrl.u32 %v140_v27, 7 }
  0x2d   :  { %262 = vmatprep.mubr.bf16.mxu1 %v460_v19  ;;  %v297_v20 = vld [vmem:[%s512_s2] ss:$0 sm:$0xff]  ;;  %s461_s2 = smov [#allocation8]  }
  0x2e   :  { %233 = vmatpush1.bf16.msra.mxu1 %v342_v6  ;;  %v142_v29 = vsub.s32 0, %v141_v28  ;;  %v138_v30 = vld [vmem:[%s514_s4] sm:$0x3]  ;;  %v146_v40 = vsub.s32 1, %v141_v28  ;;  %s287_s13 = sshll.u32 %s461_s2, 4  ;;  %s288_s13 = int_to_ptr.vmem [resolvable:$true] %s287_s13 }
  0x2f   :  { %234 = vmatprep.subr.bf16.mxu1 %v343_v7  ;;  %s425_s4 = scalar_lea.vmem %s288_s13, 128  ;;  %p430_p2 = scmp.lt.s32.totalorder %s288_s13, %s288_s13 }
  0x30   :  { %v143_v31 = vrot.slane %v138_v30, %v142_v29  ;;  %v147_v41 = vrot.slane %v138_v30, %v146_v40  ;;  %p426_p1 = scmp.ne.s32.totalorder %s288_s13, %s425_s4  ;;  %p431_p3 = scmp.lt.s32.totalorder %s425_s4, %s425_s4 }
  0x32   :  { %235 = vmatpush1.bf16.msra.mxu1 %v345_v8  ;;  %p432_p4 = por %p431_p3, %p430_p2 }
  0x33   :  { %236 = vmatprep.subr.bf16.mxu1 %v346_v9 }
  0x34   :  { %p433_p5 = pnand %p432_p4, %p426_p1 }
  0x36   :  { %237 = vmatpush1.bf16.msra.mxu1 %v348_v10 }
  0x37   :  { %238 = vmatprep.subr.bf16.mxu1 %v349_v11 }
  0x3a   :  { %239 = vmatpush1.bf16.msra.mxu1 %v351_v12 }
  0x3b   :  { %240 = vmatprep.subr.bf16.mxu1 %v352_v13 }
  0x3e   :  { %241 = vmatpush1.bf16.msra.mxu1 %v354_v14 }
  0x3f   :  { %242 = vmatprep.subr.bf16.mxu1 %v355_v15 }
  0x42   :  { %243 = vmatpush1.bf16.msra.mxu1 %v357_v16 }
  0x43   :  { %244 = vmatprep.subr.bf16.mxu1 %v358_v17 }
  0x46   :  { %245 = vmatpush1.bf16.msra.mxu1 %v360_v18 }
  0xeb   :  { %v115_v21 = vpop.f32.mrf.mxu0 }
  0xec   :  { %v116_v22 = vadd.f32 %v297_v20, %v115_v21 }
  0xed   :  { %v323_v23 = vpop.f32.mrf.mxu0 }
  0xee   :  { %v121_v24 = vpack.c.bf16 %v116_v22, %v116_v22 }
  0xef   :  { %v118_v25 = vpop.f32.mrf.mxu0 }
  0xf0   :  { %263 = vmatmul.mubr.bf16.vlgmr.msra.gmra.mxu1 %v121_v24 }
  0xf1   :  { %v324_v26 = vpop.f32.mrf.mxu0 }
 0x1b0   :  { %v264_v32 = vpop.f32.mrf.mxu1 }
 0x1b1   :  { %v265_v33 = vadd.f32 %v264_v32, %v143_v31 }
 0x1b2   :  { %v266_v34 = vpop.f32.mrf.mxu1 }
 0x1b3   :  { %v316_v35 = vmul.f32 -1.442695, %v265_v33  ;;  %v267_v42 = vadd.f32 %v266_v34, %v147_v41 }
 0x1b4   :  { %v268_v36 = vpop.f32.mrf.mxu1 }
 0x1b5   :  { %361 = vpow2.f32 %v316_v35 }
 0x1b6   :  { %v269_v37 = vpop.f32.mrf.mxu1 }
 0x1c2   :  { %v362_v38 = vpop.eup %361 }
 0x1c3   :  { %v274_v39 = vadd.f32 1.0, %v362_v38 }
 0x1c5   :  { %363 = vrcp.f32 %v274_v39 }
 0x1d2   :  { %v364_v43 = vpop.eup %363 }
 0x1d3   :  { %v277_v44 = vmul.f32 %v364_v43, %v267_v42 }
 0x1d5   :  { %v278_v45 = vadd.f32 %v277_v44, %v116_v22 }
 0x1d7   :  { %v279_v46 = vmul.f32 0.70710677, %v278_v45 }
 0x1d9   :  { %280 = vst [vmem:[#allocation8] sm:$0xff] %v279_v46 }
 0x1da   :  { %436 = shalt.err (!%p433_p5)
}
 0x1db   :  { %290 = dma.vmem_to_hbm [thread:$0]  %s288_s13, 128, %s515_s5, [#allocation4]  }
 0x1dc   :  { %449 = dma.done.wait [#allocation4], 128  }
 0x1dd   :  { %450 = vsyncadd [#allocation4], 4294967168 }
 0x1de   :  { %294 = vsyncpa [#allocation3], 1 }
 0x1df   :  { %295 = vsyncpa [#allocation6], 1 }
 0x1e0   :  { %296 = vsyncpa [#allocation4], 1 }

</bundles_post_ra>
